<compile_context>
chip_gen: v5e
topology: v5e:2x2
jax: 0.10.0
libtpu: 0.0.40
codegen_flags: <defaults>
</compile_context>

<pallas_src>
import functools

import jax
import jax.numpy as jnp
from jax import lax
from jax.experimental import pallas as pl
from jax.experimental.pallas import tpu as pltpu


def _round_up(n, m):
    return (n + m - 1) // m * m


def _rnn_kernel(pre0_ref, wihr_ref, whh_ref, brest_ref, fcw_ref, fcb_ref,
                out_ref, hseq_ref, *, layer_dim, seq, tb, hidden):
    """Multi-layer relu-RNN recurrence + fc on the last time step.

    pre0_ref : (seq, tb, hidden)     layer-0 pre-activations (x @ W_ih0^T + b0), time-major
    wihr_ref : (Lr, hidden, hidden)  input weights for layers 1..L-1 (pre-transposed)
    whh_ref  : (L,  hidden, hidden)  recurrent weights (pre-transposed)
    brest_ref: (Lr, 1, hidden)       b_ih + b_hh for layers 1..L-1
    fcw_ref  : (hidden, out_p)       fc weight (pre-transposed)
    fcb_ref  : (1, out_p)
    out_ref  : (tb, out_p)
    hseq_ref : (seq*tb, hidden)      scratch: hidden sequence / pre-activations
    """
    last = layer_dim - 1
    unroll = True if seq <= 16 else 2

    def recurrence(l, w_h, read_pre):
        def step(t, h_prev):
            pre_t = read_pre(t)
            h = jnp.maximum(
                pre_t + jnp.dot(h_prev, w_h, preferred_element_type=jnp.float32),
                0.0)
            if l != last:  # last layer's per-step hidden is never re-read -> skip store
                start = pl.multiple_of(t * tb, tb)
                hseq_ref[pl.ds(start, tb), :] = h
            return h
        return lax.fori_loop(0, seq, step,
                             jnp.zeros((tb, hidden), jnp.float32),
                             unroll=unroll)

    # ---- layer 0: input GEMM already hoisted outside the kernel; only the recurrence.
    h_last = recurrence(0, whh_ref[0], lambda t: pre0_ref[t])

    # ---- layers 1 .. L-1
    for l in range(1, layer_dim):
        w_in = wihr_ref[l - 1]
        b = brest_ref[l - 1]
        # Hoisted input projection: ONE (seq*tb, H) x (H, H) GEMM, bias folded in.
        pre_all = jnp.dot(hseq_ref[...], w_in,
                          preferred_element_type=jnp.float32) + b
        hseq_ref[...] = pre_all

        def read_pre(t):
            start = pl.multiple_of(t * tb, tb)
            return hseq_ref[pl.ds(start, tb), :]

        h_last = recurrence(l, whh_ref[l], read_pre)

    out = jnp.dot(h_last, fcw_ref[...],
                  preferred_element_type=jnp.float32) + fcb_ref[...]
    out_ref[...] = out.astype(out_ref.dtype)


def rnn_model_forward(x, params, layer_dim):
    """x: (batch, seq, input_dim) float32 -> (batch, output_dim) float32."""
    batch, seq, _ = x.shape
    hidden = params["w_hh"].shape[-1]
    output_dim = params["fc_w"].shape[0]
    n_rest = params["w_ihr"].shape[0]          # == max(layer_dim - 1, 1)

    hidden_p = _round_up(hidden, 128)          # lane-dense hidden
    out_p = _round_up(output_dim, 128)         # lane-dense output (unmasked vst)

    # ---- batch tile: multiple of 8 sublanes, bounded per-tile VMEM residency.
    def vmem_est(tb_):
        f32 = 4
        return (3 * seq * tb_ * hidden_p * f32                    # pre0 (x2 dbl-buf) + hseq scratch
                + 2 * tb_ * out_p * f32                           # out (x2)
                + 2 * (n_rest + layer_dim) * hidden_p * hidden_p * f32
                + (n_rest + 1) * hidden_p * f32
                + hidden_p * out_p * f32)

    tb = min(128, _round_up(batch, 8))
    while tb > 8 and vmem_est(tb) > 48 * 1024 * 1024:
        tb //= 2
    batch_p = _round_up(batch, tb)
    grid = (batch_p // tb,)
    vmem_limit = int(min(64 * 1024 * 1024,
                         max(2 * vmem_est(tb), 8 * 1024 * 1024)))

    # ---- layer-0 input projection hoisted into one large XLA GEMM, time-major output
    #      (avoids a standalone HBM transpose of x before the kernel).
    b0 = params["b_ih"][0] + params["b_hh"][0]
    pre0 = jnp.einsum("bsi,hi->sbh", x, params["w_ih0"]) + b0      # (seq, batch, hidden)
    pre0 = jnp.pad(pre0, ((0, 0), (0, batch_p - batch), (0, hidden_p - hidden)))

    def pad_hh(w):  # (n, hidden, hidden) -> pre-transposed + padded (n, Hp, Hp)
        wt = jnp.transpose(w, (0, 2, 1))
        return jnp.pad(wt, ((0, 0), (0, hidden_p - hidden), (0, hidden_p - hidden)))

    wihr = pad_hh(params["w_ihr"])                                  # (Lr, Hp, Hp)
    whh = pad_hh(params["w_hh"])                                    # (L,  Hp, Hp)
    if layer_dim > 1:
        brest = params["b_ih"][1:] + params["b_hh"][1:]             # (L-1, hidden)
    else:
        brest = jnp.zeros((1, hidden), jnp.float32)                 # dummy (unused)
    brest = jnp.pad(brest, ((0, 0), (0, hidden_p - hidden)))[:, None, :]
    fcw = jnp.pad(params["fc_w"].T,
                  ((0, hidden_p - hidden), (0, out_p - output_dim)))
    fcb = jnp.pad(params["fc_b"], (0, out_p - output_dim))[None, :]

    kernel = functools.partial(_rnn_kernel, layer_dim=layer_dim, seq=seq,
                               tb=tb, hidden=hidden_p)

    out_padded = pl.pallas_call(
        kernel,
        out_shape=jax.ShapeDtypeStruct((batch_p, out_p), jnp.float32),
        grid_spec=pltpu.PrefetchScalarGridSpec(
            num_scalar_prefetch=0,
            grid=grid,
            in_specs=[
                pl.BlockSpec((seq, tb, hidden_p), lambda i: (0, i, 0)),           # pre0
                pl.BlockSpec((n_rest, hidden_p, hidden_p), lambda i: (0, 0, 0)),  # w_ih (l>0)
                pl.BlockSpec((layer_dim, hidden_p, hidden_p), lambda i: (0, 0, 0)),  # w_hh
                pl.BlockSpec((n_rest, 1, hidden_p), lambda i: (0, 0, 0)),         # biases (l>0)
                pl.BlockSpec((hidden_p, out_p), lambda i: (0, 0)),                # fc_w
                pl.BlockSpec((1, out_p), lambda i: (0, 0)),                       # fc_b
            ],
            out_specs=pl.BlockSpec((tb, out_p), lambda i: (i, 0)),
            scratch_shapes=[pltpu.VMEM((seq * tb, hidden_p), jnp.float32)],
        ),
        compiler_params=pltpu.CompilerParams(
            dimension_semantics=("parallel",),
            vmem_limit_bytes=vmem_limit,
        ),
    )(pre0, wihr, whh, brest, fcw, fcb)

    return out_padded[:batch, :output_dim]


def ref_forward(x, params, layer_dim):
    """Pure-JAX reference matching PyTorch nn.RNN(relu, batch_first) + fc."""
    batch, seq, _ = x.shape
    hidden = params["w_hh"].shape[-1]
    inp = x
    for l in range(layer_dim):
        w_in = params["w_ih0"] if l == 0 else params["w_ihr"][l - 1]
        h = jnp.zeros((batch, hidden), jnp.float32)
        outs = []
        for t in range(seq):
            h = jax.nn.relu(inp[:, t] @ w_in.T + h @ params["w_hh"][l].T
                            + params["b_ih"][l] + params["b_hh"][l])
            outs.append(h)
        inp = jnp.stack(outs, axis=1)
    return inp[:, -1] @ params["fc_w"].T + params["fc_b"]


def init_params(key, input_dim, hidden_dim, layer_dim, output_dim):
    ks = jax.random.split(key, 8)
    s = 1.0 / jnp.sqrt(hidden_dim)
    n_rest = max(layer_dim - 1, 1)  # dummy row if layer_dim == 1 (unused)
    return {
        "w_ih0": jax.random.uniform(ks[0], (hidden_dim, input_dim), jnp.float32, -s, s),
        "w_ihr": jax.random.uniform(ks[1], (n_rest, hidden_dim, hidden_dim), jnp.float32, -s, s),
        "w_hh": jax.random.uniform(ks[2], (layer_dim, hidden_dim, hidden_dim), jnp.float32, -s, s),
        "b_ih": jax.random.uniform(ks[3], (layer_dim, hidden_dim), jnp.float32, -s, s),
        "b_hh": jax.random.uniform(ks[4], (layer_dim, hidden_dim), jnp.float32, -s, s),
        "fc_w": jax.random.uniform(ks[5], (output_dim, hidden_dim), jnp.float32, -s, s),
        "fc_b": jax.random.uniform(ks[6], (output_dim,), jnp.float32, -s, s),
    }


if __name__ == "__main__":
    batch, seq, input_dim, hidden_dim, layer_dim, output_dim = 2, 8, 16, 32, 2, 4

    key = jax.random.PRNGKey(0)
    kx, kp = jax.random.split(key)
    x = jax.random.normal(kx, (batch, seq, input_dim), jnp.float32)
    params = init_params(kp, input_dim, hidden_dim, layer_dim, output_dim)

    out = rnn_model_forward(x, params, layer_dim)
    out = jax.block_until_ready(out)

    ref = ref_forward(x, params, layer_dim)
    assert out.shape == (batch, output_dim)
    assert jnp.allclose(out, ref, atol=1e-4, rtol=1e-4), "mismatch vs reference"

    print("KERNEL_OK")
</pallas_src>

<mosaic_0001>
module attributes {stable_mosaic.version = 11 : i64} {
  func.func @_rnn_kernel(%arg0: i32, %arg1: memref<8x8x128xf32, #tpu.memory_space<vmem>>, %arg2: memref<1x128x128xf32, #tpu.memory_space<vmem>>, %arg3: memref<2x128x128xf32, #tpu.memory_space<vmem>>, %arg4: memref<1x1x128xf32, #tpu.memory_space<vmem>>, %arg5: memref<128x128xf32, #tpu.memory_space<vmem>>, %arg6: memref<1x128xf32, #tpu.memory_space<vmem>>, %arg7: memref<8x128xf32, #tpu.memory_space<vmem>>, %arg8: memref<64x128xf32, #tpu.memory_space<vmem>>) attributes {dimension_semantics = [#tpu.dimension_semantics<parallel>], iteration_bounds = array<i64: 1>, scalar_prefetch = 0 : i64, scratch_operands = 1 : i64, tpu.core_type = #tpu.core_type<tc>, window_params = [{transform_indices = @transform_0, window_bounds = array<i64: 8, 8, 128>}, {pipeline_mode = #tpu.pipeline_mode<synchronous>, transform_indices = @transform_1, window_bounds = array<i64: 1, 128, 128>}, {pipeline_mode = #tpu.pipeline_mode<synchronous>, transform_indices = @transform_2, window_bounds = array<i64: 2, 128, 128>}, {pipeline_mode = #tpu.pipeline_mode<synchronous>, transform_indices = @transform_3, window_bounds = array<i64: 1, 1, 128>}, {pipeline_mode = #tpu.pipeline_mode<synchronous>, transform_indices = @transform_4, window_bounds = array<i64: 128, 128>}, {pipeline_mode = #tpu.pipeline_mode<synchronous>, transform_indices = @transform_5, window_bounds = array<i64: 1, 128>}, {transform_indices = @transform_6, window_bounds = array<i64: 8, 128>}]} {
    %c0 = arith.constant 0 : index
    %c0_0 = arith.constant 0 : index
    %c0_1 = arith.constant 0 : index
    %0 = vector.load %arg3[%c0, %c0_0, %c0_1] : memref<2x128x128xf32, #tpu.memory_space<vmem>>, vector<1x128x128xf32>
    %1 = vector.shape_cast %0 : vector<1x128x128xf32> to vector<128x128xf32>
    %cst = arith.constant 0.000000e+00 : f32
    %2 = vector.broadcast %cst : f32 to vector<8x128xf32>
    %c0_i32 = arith.constant 0 : i32
    %3 = arith.index_cast %c0_i32 : i32 to index
    %c0_2 = arith.constant 0 : index
    %c0_3 = arith.constant 0 : index
    %4 = vector.load %arg1[%3, %c0_2, %c0_3] : memref<8x8x128xf32, #tpu.memory_space<vmem>>, vector<1x8x128xf32>
    %5 = vector.shape_cast %4 : vector<1x8x128xf32> to vector<8x128xf32>
    %cst_4 = arith.constant dense<0.000000e+00> : vector<8x128xf32>
    %6 = tpu.matmul %2, %1, %cst_4 {dimension_numbers = #tpu.dot_dimension_numbers<[1], [0], [0], [1], [0, 0, 1, 1], [], []>} : vector<8x128xf32>, vector<128x128xf32>, vector<8x128xf32> -> vector<8x128xf32>
    %7 = arith.addf %5, %6 : vector<8x128xf32>
    %cst_5 = arith.constant 0.000000e+00 : f32
    %8 = vector.broadcast %cst_5 : f32 to vector<8x128xf32>
    %9 = arith.maximumf %7, %8 : vector<8x128xf32>
    %c8_i32 = arith.constant 8 : i32
    %10 = arith.muli %c0_i32, %c8_i32 : i32
    %11 = tpu.assume_multiple %10, 8 : i32
    %12 = arith.index_cast %11 : i32 to index
    %c0_6 = arith.constant 0 : index
    %13 = vector.load %arg8[%12, %c0_6] : memref<64x128xf32, #tpu.memory_space<vmem>>, vector<8x128xf32>
    tpu.vector_store %arg8[%12, %c0_6], %9 {strides = array<i32>} : memref<64x128xf32, #tpu.memory_space<vmem>>, vector<8x128xf32>,
    %c1_i32 = arith.constant 1 : i32
    %14 = arith.index_cast %c1_i32 : i32 to index
    %c0_7 = arith.constant 0 : index
    %c0_8 = arith.constant 0 : index
    %15 = vector.load %arg1[%14, %c0_7, %c0_8] : memref<8x8x128xf32, #tpu.memory_space<vmem>>, vector<1x8x128xf32>
    %16 = vector.shape_cast %15 : vector<1x8x128xf32> to vector<8x128xf32>
    %cst_9 = arith.constant dense<0.000000e+00> : vector<8x128xf32>
    %17 = tpu.matmul %9, %1, %cst_9 {dimension_numbers = #tpu.dot_dimension_numbers<[1], [0], [0], [1], [0, 0, 1, 1], [], []>} : vector<8x128xf32>, vector<128x128xf32>, vector<8x128xf32> -> vector<8x128xf32>
    %18 = arith.addf %16, %17 : vector<8x128xf32>
    %cst_10 = arith.constant 0.000000e+00 : f32
    %19 = vector.broadcast %cst_10 : f32 to vector<8x128xf32>
    %20 = arith.maximumf %18, %19 : vector<8x128xf32>
    %c8_i32_11 = arith.constant 8 : i32
    %21 = arith.muli %c1_i32, %c8_i32_11 : i32
    %22 = tpu.assume_multiple %21, 8 : i32
    %23 = arith.index_cast %22 : i32 to index
    %c0_12 = arith.constant 0 : index
    %24 = vector.load %arg8[%23, %c0_12] : memref<64x128xf32, #tpu.memory_space<vmem>>, vector<8x128xf32>
    tpu.vector_store %arg8[%23, %c0_12], %20 {strides = array<i32>} : memref<64x128xf32, #tpu.memory_space<vmem>>, vector<8x128xf32>,
    %c2_i32 = arith.constant 2 : i32
    %25 = arith.index_cast %c2_i32 : i32 to index
    %c0_13 = arith.constant 0 : index
    %c0_14 = arith.constant 0 : index
    %26 = vector.load %arg1[%25, %c0_13, %c0_14] : memref<8x8x128xf32, #tpu.memory_space<vmem>>, vector<1x8x128xf32>
    %27 = vector.shape_cast %26 : vector<1x8x128xf32> to vector<8x128xf32>
    %cst_15 = arith.constant dense<0.000000e+00> : vector<8x128xf32>
    %28 = tpu.matmul %20, %1, %cst_15 {dimension_numbers = #tpu.dot_dimension_numbers<[1], [0], [0], [1], [0, 0, 1, 1], [], []>} : vector<8x128xf32>, vector<128x128xf32>, vector<8x128xf32> -> vector<8x128xf32>
    %29 = arith.addf %27, %28 : vector<8x128xf32>
    %cst_16 = arith.constant 0.000000e+00 : f32
    %30 = vector.broadcast %cst_16 : f32 to vector<8x128xf32>
    %31 = arith.maximumf %29, %30 : vector<8x128xf32>
    %c8_i32_17 = arith.constant 8 : i32
    %32 = arith.muli %c2_i32, %c8_i32_17 : i32
    %33 = tpu.assume_multiple %32, 8 : i32
    %34 = arith.index_cast %33 : i32 to index
    %c0_18 = arith.constant 0 : index
    %35 = vector.load %arg8[%34, %c0_18] : memref<64x128xf32, #tpu.memory_space<vmem>>, vector<8x128xf32>
    tpu.vector_store %arg8[%34, %c0_18], %31 {strides = array<i32>} : memref<64x128xf32, #tpu.memory_space<vmem>>, vector<8x128xf32>,
    %c3_i32 = arith.constant 3 : i32
    %36 = arith.index_cast %c3_i32 : i32 to index
    %c0_19 = arith.constant 0 : index
    %c0_20 = arith.constant 0 : index
    %37 = vector.load %arg1[%36, %c0_19, %c0_20] : memref<8x8x128xf32, #tpu.memory_space<vmem>>, vector<1x8x128xf32>
    %38 = vector.shape_cast %37 : vector<1x8x128xf32> to vector<8x128xf32>
    %cst_21 = arith.constant dense<0.000000e+00> : vector<8x128xf32>
    %39 = tpu.matmul %31, %1, %cst_21 {dimension_numbers = #tpu.dot_dimension_numbers<[1], [0], [0], [1], [0, 0, 1, 1], [], []>} : vector<8x128xf32>, vector<128x128xf32>, vector<8x128xf32> -> vector<8x128xf32>
    %40 = arith.addf %38, %39 : vector<8x128xf32>
    %cst_22 = arith.constant 0.000000e+00 : f32
    %41 = vector.broadcast %cst_22 : f32 to vector<8x128xf32>
    %42 = arith.maximumf %40, %41 : vector<8x128xf32>
    %c8_i32_23 = arith.constant 8 : i32
    %43 = arith.muli %c3_i32, %c8_i32_23 : i32
    %44 = tpu.assume_multiple %43, 8 : i32
    %45 = arith.index_cast %44 : i32 to index
    %c0_24 = arith.constant 0 : index
    %46 = vector.load %arg8[%45, %c0_24] : memref<64x128xf32, #tpu.memory_space<vmem>>, vector<8x128xf32>
    tpu.vector_store %arg8[%45, %c0_24], %42 {strides = array<i32>} : memref<64x128xf32, #tpu.memory_space<vmem>>, vector<8x128xf32>,
    %c4_i32 = arith.constant 4 : i32
    %47 = arith.index_cast %c4_i32 : i32 to index
    %c0_25 = arith.constant 0 : index
    %c0_26 = arith.constant 0 : index
    %48 = vector.load %arg1[%47, %c0_25, %c0_26] : memref<8x8x128xf32, #tpu.memory_space<vmem>>, vector<1x8x128xf32>
    %49 = vector.shape_cast %48 : vector<1x8x128xf32> to vector<8x128xf32>
    %cst_27 = arith.constant dense<0.000000e+00> : vector<8x128xf32>
    %50 = tpu.matmul %42, %1, %cst_27 {dimension_numbers = #tpu.dot_dimension_numbers<[1], [0], [0], [1], [0, 0, 1, 1], [], []>} : vector<8x128xf32>, vector<128x128xf32>, vector<8x128xf32> -> vector<8x128xf32>
    %51 = arith.addf %49, %50 : vector<8x128xf32>
    %cst_28 = arith.constant 0.000000e+00 : f32
    %52 = vector.broadcast %cst_28 : f32 to vector<8x128xf32>
    %53 = arith.maximumf %51, %52 : vector<8x128xf32>
    %c8_i32_29 = arith.constant 8 : i32
    %54 = arith.muli %c4_i32, %c8_i32_29 : i32
    %55 = tpu.assume_multiple %54, 8 : i32
    %56 = arith.index_cast %55 : i32 to index
    %c0_30 = arith.constant 0 : index
    %57 = vector.load %arg8[%56, %c0_30] : memref<64x128xf32, #tpu.memory_space<vmem>>, vector<8x128xf32>
    tpu.vector_store %arg8[%56, %c0_30], %53 {strides = array<i32>} : memref<64x128xf32, #tpu.memory_space<vmem>>, vector<8x128xf32>,
    %c5_i32 = arith.constant 5 : i32
    %58 = arith.index_cast %c5_i32 : i32 to index
    %c0_31 = arith.constant 0 : index
    %c0_32 = arith.constant 0 : index
    %59 = vector.load %arg1[%58, %c0_31, %c0_32] : memref<8x8x128xf32, #tpu.memory_space<vmem>>, vector<1x8x128xf32>
    %60 = vector.shape_cast %59 : vector<1x8x128xf32> to vector<8x128xf32>
    %cst_33 = arith.constant dense<0.000000e+00> : vector<8x128xf32>
    %61 = tpu.matmul %53, %1, %cst_33 {dimension_numbers = #tpu.dot_dimension_numbers<[1], [0], [0], [1], [0, 0, 1, 1], [], []>} : vector<8x128xf32>, vector<128x128xf32>, vector<8x128xf32> -> vector<8x128xf32>
    %62 = arith.addf %60, %61 : vector<8x128xf32>
    %cst_34 = arith.constant 0.000000e+00 : f32
    %63 = vector.broadcast %cst_34 : f32 to vector<8x128xf32>
    %64 = arith.maximumf %62, %63 : vector<8x128xf32>
    %c8_i32_35 = arith.constant 8 : i32
    %65 = arith.muli %c5_i32, %c8_i32_35 : i32
    %66 = tpu.assume_multiple %65, 8 : i32
    %67 = arith.index_cast %66 : i32 to index
    %c0_36 = arith.constant 0 : index
    %68 = vector.load %arg8[%67, %c0_36] : memref<64x128xf32, #tpu.memory_space<vmem>>, vector<8x128xf32>
    tpu.vector_store %arg8[%67, %c0_36], %64 {strides = array<i32>} : memref<64x128xf32, #tpu.memory_space<vmem>>, vector<8x128xf32>,
    %c6_i32 = arith.constant 6 : i32
    %69 = arith.index_cast %c6_i32 : i32 to index
    %c0_37 = arith.constant 0 : index
    %c0_38 = arith.constant 0 : index
    %70 = vector.load %arg1[%69, %c0_37, %c0_38] : memref<8x8x128xf32, #tpu.memory_space<vmem>>, vector<1x8x128xf32>
    %71 = vector.shape_cast %70 : vector<1x8x128xf32> to vector<8x128xf32>
    %cst_39 = arith.constant dense<0.000000e+00> : vector<8x128xf32>
    %72 = tpu.matmul %64, %1, %cst_39 {dimension_numbers = #tpu.dot_dimension_numbers<[1], [0], [0], [1], [0, 0, 1, 1], [], []>} : vector<8x128xf32>, vector<128x128xf32>, vector<8x128xf32> -> vector<8x128xf32>
    %73 = arith.addf %71, %72 : vector<8x128xf32>
    %cst_40 = arith.constant 0.000000e+00 : f32
    %74 = vector.broadcast %cst_40 : f32 to vector<8x128xf32>
    %75 = arith.maximumf %73, %74 : vector<8x128xf32>
    %c8_i32_41 = arith.constant 8 : i32
    %76 = arith.muli %c6_i32, %c8_i32_41 : i32
    %77 = tpu.assume_multiple %76, 8 : i32
    %78 = arith.index_cast %77 : i32 to index
    %c0_42 = arith.constant 0 : index
    %79 = vector.load %arg8[%78, %c0_42] : memref<64x128xf32, #tpu.memory_space<vmem>>, vector<8x128xf32>
    tpu.vector_store %arg8[%78, %c0_42], %75 {strides = array<i32>} : memref<64x128xf32, #tpu.memory_space<vmem>>, vector<8x128xf32>,
    %c7_i32 = arith.constant 7 : i32
    %80 = arith.index_cast %c7_i32 : i32 to index
    %c0_43 = arith.constant 0 : index
    %c0_44 = arith.constant 0 : index
    %81 = vector.load %arg1[%80, %c0_43, %c0_44] : memref<8x8x128xf32, #tpu.memory_space<vmem>>, vector<1x8x128xf32>
    %82 = vector.shape_cast %81 : vector<1x8x128xf32> to vector<8x128xf32>
    %cst_45 = arith.constant dense<0.000000e+00> : vector<8x128xf32>
    %83 = tpu.matmul %75, %1, %cst_45 {dimension_numbers = #tpu.dot_dimension_numbers<[1], [0], [0], [1], [0, 0, 1, 1], [], []>} : vector<8x128xf32>, vector<128x128xf32>, vector<8x128xf32> -> vector<8x128xf32>
    %84 = arith.addf %82, %83 : vector<8x128xf32>
    %cst_46 = arith.constant 0.000000e+00 : f32
    %85 = vector.broadcast %cst_46 : f32 to vector<8x128xf32>
    %86 = arith.maximumf %84, %85 : vector<8x128xf32>
    %c8_i32_47 = arith.constant 8 : i32
    %87 = arith.muli %c7_i32, %c8_i32_47 : i32
    %88 = tpu.assume_multiple %87, 8 : i32
    %89 = arith.index_cast %88 : i32 to index
    %c0_48 = arith.constant 0 : index
    %90 = vector.load %arg8[%89, %c0_48] : memref<64x128xf32, #tpu.memory_space<vmem>>, vector<8x128xf32>
    tpu.vector_store %arg8[%89, %c0_48], %86 {strides = array<i32>} : memref<64x128xf32, #tpu.memory_space<vmem>>, vector<8x128xf32>,
    %c8_i32_49 = arith.constant 8 : i32
    %c0_50 = arith.constant 0 : index
    %c0_51 = arith.constant 0 : index
    %c0_52 = arith.constant 0 : index
    %91 = vector.load %arg2[%c0_50, %c0_51, %c0_52] : memref<1x128x128xf32, #tpu.memory_space<vmem>>, vector<1x128x128xf32>
    %92 = vector.shape_cast %91 : vector<1x128x128xf32> to vector<128x128xf32>
    %c0_53 = arith.constant 0 : index
    %c0_54 = arith.constant 0 : index
    %c0_55 = arith.constant 0 : index
    %93 = vector.load %arg4[%c0_53, %c0_54, %c0_55] : memref<1x1x128xf32, #tpu.memory_space<vmem>>, vector<1x1x128xf32>
    %94 = vector.shape_cast %93 : vector<1x1x128xf32> to vector<1x128xf32>
    %c0_56 = arith.constant 0 : index
    %c0_57 = arith.constant 0 : index
    %95 = vector.load %arg8[%c0_56, %c0_57] : memref<64x128xf32, #tpu.memory_space<vmem>>, vector<64x128xf32>
    %cst_58 = arith.constant dense<0.000000e+00> : vector<64x128xf32>
    %96 = tpu.matmul %95, %92, %cst_58 {dimension_numbers = #tpu.dot_dimension_numbers<[1], [0], [0], [1], [0, 0, 1, 1], [], []>} : vector<64x128xf32>, vector<128x128xf32>, vector<64x128xf32> -> vector<64x128xf32>
    %97 = vector.broadcast %94 : vector<1x128xf32> to vector<64x128xf32>
    %98 = arith.addf %96, %97 : vector<64x128xf32>
    %c0_59 = arith.constant 0 : index
    %c0_60 = arith.constant 0 : index
    %99 = vector.load %arg8[%c0_59, %c0_60] : memref<64x128xf32, #tpu.memory_space<vmem>>, vector<64x128xf32>
    tpu.vector_store %arg8[%c0_59, %c0_60], %98 {strides = array<i32>} : memref<64x128xf32, #tpu.memory_space<vmem>>, vector<64x128xf32>,
    %c1 = arith.constant 1 : index
    %c0_61 = arith.constant 0 : index
    %c0_62 = arith.constant 0 : index
    %100 = vector.load %arg3[%c1, %c0_61, %c0_62] : memref<2x128x128xf32, #tpu.memory_space<vmem>>, vector<1x128x128xf32>
    %101 = vector.shape_cast %100 : vector<1x128x128xf32> to vector<128x128xf32>
    %cst_63 = arith.constant 0.000000e+00 : f32
    %102 = vector.broadcast %cst_63 : f32 to vector<8x128xf32>
    %c0_i32_64 = arith.constant 0 : i32
    %c8_i32_65 = arith.constant 8 : i32
    %103 = arith.muli %c0_i32_64, %c8_i32_65 : i32
    %104 = tpu.assume_multiple %103, 8 : i32
    %105 = arith.index_cast %104 : i32 to index
    %c0_66 = arith.constant 0 : index
    %106 = vector.load %arg8[%105, %c0_66] : memref<64x128xf32, #tpu.memory_space<vmem>>, vector<8x128xf32>
    %cst_67 = arith.constant dense<0.000000e+00> : vector<8x128xf32>
    %107 = tpu.matmul %102, %101, %cst_67 {dimension_numbers = #tpu.dot_dimension_numbers<[1], [0], [0], [1], [0, 0, 1, 1], [], []>} : vector<8x128xf32>, vector<128x128xf32>, vector<8x128xf32> -> vector<8x128xf32>
    %108 = arith.addf %106, %107 : vector<8x128xf32>
    %cst_68 = arith.constant 0.000000e+00 : f32
    %109 = vector.broadcast %cst_68 : f32 to vector<8x128xf32>
    %110 = arith.maximumf %108, %109 : vector<8x128xf32>
    %c1_i32_69 = arith.constant 1 : i32
    %c8_i32_70 = arith.constant 8 : i32
    %111 = arith.muli %c1_i32_69, %c8_i32_70 : i32
    %112 = tpu.assume_multiple %111, 8 : i32
    %113 = arith.index_cast %112 : i32 to index
    %c0_71 = arith.constant 0 : index
    %114 = vector.load %arg8[%113, %c0_71] : memref<64x128xf32, #tpu.memory_space<vmem>>, vector<8x128xf32>
    %cst_72 = arith.constant dense<0.000000e+00> : vector<8x128xf32>
    %115 = tpu.matmul %110, %101, %cst_72 {dimension_numbers = #tpu.dot_dimension_numbers<[1], [0], [0], [1], [0, 0, 1, 1], [], []>} : vector<8x128xf32>, vector<128x128xf32>, vector<8x128xf32> -> vector<8x128xf32>
    %116 = arith.addf %114, %115 : vector<8x128xf32>
    %cst_73 = arith.constant 0.000000e+00 : f32
    %117 = vector.broadcast %cst_73 : f32 to vector<8x128xf32>
    %118 = arith.maximumf %116, %117 : vector<8x128xf32>
    %c2_i32_74 = arith.constant 2 : i32
    %c8_i32_75 = arith.constant 8 : i32
    %119 = arith.muli %c2_i32_74, %c8_i32_75 : i32
    %120 = tpu.assume_multiple %119, 8 : i32
    %121 = arith.index_cast %120 : i32 to index
    %c0_76 = arith.constant 0 : index
    %122 = vector.load %arg8[%121, %c0_76] : memref<64x128xf32, #tpu.memory_space<vmem>>, vector<8x128xf32>
    %cst_77 = arith.constant dense<0.000000e+00> : vector<8x128xf32>
    %123 = tpu.matmul %118, %101, %cst_77 {dimension_numbers = #tpu.dot_dimension_numbers<[1], [0], [0], [1], [0, 0, 1, 1], [], []>} : vector<8x128xf32>, vector<128x128xf32>, vector<8x128xf32> -> vector<8x128xf32>
    %124 = arith.addf %122, %123 : vector<8x128xf32>
    %cst_78 = arith.constant 0.000000e+00 : f32
    %125 = vector.broadcast %cst_78 : f32 to vector<8x128xf32>
    %126 = arith.maximumf %124, %125 : vector<8x128xf32>
    %c3_i32_79 = arith.constant 3 : i32
    %c8_i32_80 = arith.constant 8 : i32
    %127 = arith.muli %c3_i32_79, %c8_i32_80 : i32
    %128 = tpu.assume_multiple %127, 8 : i32
    %129 = arith.index_cast %128 : i32 to index
    %c0_81 = arith.constant 0 : index
    %130 = vector.load %arg8[%129, %c0_81] : memref<64x128xf32, #tpu.memory_space<vmem>>, vector<8x128xf32>
    %cst_82 = arith.constant dense<0.000000e+00> : vector<8x128xf32>
    %131 = tpu.matmul %126, %101, %cst_82 {dimension_numbers = #tpu.dot_dimension_numbers<[1], [0], [0], [1], [0, 0, 1, 1], [], []>} : vector<8x128xf32>, vector<128x128xf32>, vector<8x128xf32> -> vector<8x128xf32>
    %132 = arith.addf %130, %131 : vector<8x128xf32>
    %cst_83 = arith.constant 0.000000e+00 : f32
    %133 = vector.broadcast %cst_83 : f32 to vector<8x128xf32>
    %134 = arith.maximumf %132, %133 : vector<8x128xf32>
    %c4_i32_84 = arith.constant 4 : i32
    %c8_i32_85 = arith.constant 8 : i32
    %135 = arith.muli %c4_i32_84, %c8_i32_85 : i32
    %136 = tpu.assume_multiple %135, 8 : i32
    %137 = arith.index_cast %136 : i32 to index
    %c0_86 = arith.constant 0 : index
    %138 = vector.load %arg8[%137, %c0_86] : memref<64x128xf32, #tpu.memory_space<vmem>>, vector<8x128xf32>
    %cst_87 = arith.constant dense<0.000000e+00> : vector<8x128xf32>
    %139 = tpu.matmul %134, %101, %cst_87 {dimension_numbers = #tpu.dot_dimension_numbers<[1], [0], [0], [1], [0, 0, 1, 1], [], []>} : vector<8x128xf32>, vector<128x128xf32>, vector<8x128xf32> -> vector<8x128xf32>
    %140 = arith.addf %138, %139 : vector<8x128xf32>
    %cst_88 = arith.constant 0.000000e+00 : f32
    %141 = vector.broadcast %cst_88 : f32 to vector<8x128xf32>
    %142 = arith.maximumf %140, %141 : vector<8x128xf32>
    %c5_i32_89 = arith.constant 5 : i32
    %c8_i32_90 = arith.constant 8 : i32
    %143 = arith.muli %c5_i32_89, %c8_i32_90 : i32
    %144 = tpu.assume_multiple %143, 8 : i32
    %145 = arith.index_cast %144 : i32 to index
    %c0_91 = arith.constant 0 : index
    %146 = vector.load %arg8[%145, %c0_91] : memref<64x128xf32, #tpu.memory_space<vmem>>, vector<8x128xf32>
    %cst_92 = arith.constant dense<0.000000e+00> : vector<8x128xf32>
    %147 = tpu.matmul %142, %101, %cst_92 {dimension_numbers = #tpu.dot_dimension_numbers<[1], [0], [0], [1], [0, 0, 1, 1], [], []>} : vector<8x128xf32>, vector<128x128xf32>, vector<8x128xf32> -> vector<8x128xf32>
    %148 = arith.addf %146, %147 : vector<8x128xf32>
    %cst_93 = arith.constant 0.000000e+00 : f32
    %149 = vector.broadcast %cst_93 : f32 to vector<8x128xf32>
    %150 = arith.maximumf %148, %149 : vector<8x128xf32>
    %c6_i32_94 = arith.constant 6 : i32
    %c8_i32_95 = arith.constant 8 : i32
    %151 = arith.muli %c6_i32_94, %c8_i32_95 : i32
    %152 = tpu.assume_multiple %151, 8 : i32
    %153 = arith.index_cast %152 : i32 to index
    %c0_96 = arith.constant 0 : index
    %154 = vector.load %arg8[%153, %c0_96] : memref<64x128xf32, #tpu.memory_space<vmem>>, vector<8x128xf32>
    %cst_97 = arith.constant dense<0.000000e+00> : vector<8x128xf32>
    %155 = tpu.matmul %150, %101, %cst_97 {dimension_numbers = #tpu.dot_dimension_numbers<[1], [0], [0], [1], [0, 0, 1, 1], [], []>} : vector<8x128xf32>, vector<128x128xf32>, vector<8x128xf32> -> vector<8x128xf32>
    %156 = arith.addf %154, %155 : vector<8x128xf32>
    %cst_98 = arith.constant 0.000000e+00 : f32
    %157 = vector.broadcast %cst_98 : f32 to vector<8x128xf32>
    %158 = arith.maximumf %156, %157 : vector<8x128xf32>
    %c7_i32_99 = arith.constant 7 : i32
    %c8_i32_100 = arith.constant 8 : i32
    %159 = arith.muli %c7_i32_99, %c8_i32_100 : i32
    %160 = tpu.assume_multiple %159, 8 : i32
    %161 = arith.index_cast %160 : i32 to index
    %c0_101 = arith.constant 0 : index
    %162 = vector.load %arg8[%161, %c0_101] : memref<64x128xf32, #tpu.memory_space<vmem>>, vector<8x128xf32>
    %cst_102 = arith.constant dense<0.000000e+00> : vector<8x128xf32>
    %163 = tpu.matmul %158, %101, %cst_102 {dimension_numbers = #tpu.dot_dimension_numbers<[1], [0], [0], [1], [0, 0, 1, 1], [], []>} : vector<8x128xf32>, vector<128x128xf32>, vector<8x128xf32> -> vector<8x128xf32>
    %164 = arith.addf %162, %163 : vector<8x128xf32>
    %cst_103 = arith.constant 0.000000e+00 : f32
    %165 = vector.broadcast %cst_103 : f32 to vector<8x128xf32>
    %166 = arith.maximumf %164, %165 : vector<8x128xf32>
    %c8_i32_104 = arith.constant 8 : i32
    %c0_105 = arith.constant 0 : index
    %c0_106 = arith.constant 0 : index
    %167 = vector.load %arg5[%c0_105, %c0_106] : memref<128x128xf32, #tpu.memory_space<vmem>>, vector<128x128xf32>
    %cst_107 = arith.constant dense<0.000000e+00> : vector<8x128xf32>
    %168 = tpu.matmul %166, %167, %cst_107 {dimension_numbers = #tpu.dot_dimension_numbers<[1], [0], [0], [1], [0, 0, 1, 1], [], []>} : vector<8x128xf32>, vector<128x128xf32>, vector<8x128xf32> -> vector<8x128xf32>
    %c0_108 = arith.constant 0 : index
    %c0_109 = arith.constant 0 : index
    %169 = vector.load %arg6[%c0_108, %c0_109] : memref<1x128xf32, #tpu.memory_space<vmem>>, vector<1x128xf32>
    %170 = vector.broadcast %169 : vector<1x128xf32> to vector<8x128xf32>
    %171 = arith.addf %168, %170 : vector<8x128xf32>
    %c0_110 = arith.constant 0 : index
    %c0_111 = arith.constant 0 : index
    %172 = vector.load %arg7[%c0_110, %c0_111] : memref<8x128xf32, #tpu.memory_space<vmem>>, vector<8x128xf32>
    tpu.vector_store %arg7[%c0_110, %c0_111], %171 {strides = array<i32>} : memref<8x128xf32, #tpu.memory_space<vmem>>, vector<8x128xf32>,
    return
  }
  func.func @transform_0(%arg0: i32) -> (i32, i32, i32) {
    %c0_i32 = arith.constant 0 : i32
    %c0_i32_0 = arith.constant 0 : i32
    %c0_i32_1 = arith.constant 0 : i32
    return %c0_i32, %arg0, %c0_i32_0 : i32, i32, i32
  }
  func.func @transform_1(%arg0: i32) -> (i32, i32, i32) {
    %c0_i32 = arith.constant 0 : i32
    %c0_i32_0 = arith.constant 0 : i32
    %c0_i32_1 = arith.constant 0 : i32
    %c0_i32_2 = arith.constant 0 : i32
    return %c0_i32, %c0_i32_0, %c0_i32_1 : i32, i32, i32
  }
  func.func @transform_2(%arg0: i32) -> (i32, i32, i32) {
    %c0_i32 = arith.constant 0 : i32
    %c0_i32_0 = arith.constant 0 : i32
    %c0_i32_1 = arith.constant 0 : i32
    %c0_i32_2 = arith.constant 0 : i32
    return %c0_i32, %c0_i32_0, %c0_i32_1 : i32, i32, i32
  }
  func.func @transform_3(%arg0: i32) -> (i32, i32, i32) {
    %c0_i32 = arith.constant 0 : i32
    %c0_i32_0 = arith.constant 0 : i32
    %c0_i32_1 = arith.constant 0 : i32
    %c0_i32_2 = arith.constant 0 : i32
    return %c0_i32, %c0_i32_0, %c0_i32_1 : i32, i32, i32
  }
  func.func @transform_4(%arg0: i32) -> (i32, i32) {
    %c0_i32 = arith.constant 0 : i32
    %c0_i32_0 = arith.constant 0 : i32
    %c0_i32_1 = arith.constant 0 : i32
    return %c0_i32, %c0_i32_0 : i32, i32
  }
  func.func @transform_5(%arg0: i32) -> (i32, i32) {
    %c0_i32 = arith.constant 0 : i32
    %c0_i32_0 = arith.constant 0 : i32
    %c0_i32_1 = arith.constant 0 : i32
    return %c0_i32, %c0_i32_0 : i32, i32
  }
  func.func @transform_6(%arg0: i32) -> (i32, i32) {
    %c0_i32 = arith.constant 0 : i32
    %c0_i32_0 = arith.constant 0 : i32
    return %arg0, %c0_i32 : i32, i32
  }
}

</mosaic_0001>

<bundles_post_ra>
// kernel: tpu_custom_call.1
= control target key start
LH: loop header
LB: loop body
LE: loop exit
PB: predicated region body
PF: predicated region fallthrough
CT: control target
= control target key end

     0   :  { %11 = vsyncpa [#allocation4], 0  ;;  %s1202_s0 = inlined_call_operand.hbm [shape: f32[8,8,128], index: 0, kind: input, shape index: {}]   ;;  %s1203_s1 = inlined_call_operand.hbm [shape: f32[1,128,128], index: 1, kind: input, shape index: {}]   ;;  %s1204_s2 = inlined_call_operand.hbm [shape: f32[2,128,128], index: 2, kind: input, shape index: {}]   ;;  %s1205_s3 = inlined_call_operand.vmem [shape: f32[1,1,128], index: 3, kind: input, shape index: {}]   ;;  %s1206_s4 = inlined_call_operand.hbm [shape: f32[128,128], index: 4, kind: input, shape index: {}]   ;;  %s1207_s5 = inlined_call_operand.vmem [shape: f32[1,128], index: 5, kind: input, shape index: {}]   ;;  %s1208_s6 = inlined_call_operand.hbm [shape: f32[8,128], index: 6, kind: output, shape index: {}]  }
   0x1   :  { %12 = vsyncpa [#allocation7], 0 }
   0x2   :  { %13 = vsyncpa [#allocation10], 0 }
   0x3   :  { %14 = vsyncpa [#allocation5], 0  ;;  %s32_s23 = sshll.u32 %s1203_s1, 4  ;;  %s785_s24 = smov [#allocation6]   ;;  %s33_s23 = int_to_ptr.hbm [resolvable:$true] %s32_s23 }
   0x4   :  { %s34_s25 = sshll.u32 %s785_s24, 4  ;;  %s19_s28 = sshll.u32 %s1202_s0, 4  ;;  %s35_s25 = int_to_ptr.vmem [resolvable:$true] %s34_s25  ;;  %s20_s28 = int_to_ptr.hbm [resolvable:$true] %s19_s28 }
   0x5   :  { %s786_s29 = smov 128   ;;  %s787_s30 = smov 8  }
   0x6   :  { %40 = dma.hbm_to_vmem [thread:$0]  %s33_s23, 2048, %s35_s25, [#allocation7], %s786_s29, %s786_s29, %s787_s30  }
   0x7   :  { %s788_s7 = smov [#allocation3]   ;;  %s45_s11 = sshll.u32 %s1204_s2, 4  ;;  %s46_s11 = int_to_ptr.hbm [resolvable:$true] %s45_s11 }
   0x8   :  { %s21_s8 = sshll.u32 %s788_s7, 4  ;;  %s60_s13 = sshll.u32 %s1206_s4, 4  ;;  %s22_s8 = int_to_ptr.vmem [resolvable:$true] %s21_s8  ;;  %s61_s13 = int_to_ptr.hbm [resolvable:$true] %s60_s13 }
   0x9   :  { %27 = dma.hbm_to_vmem [thread:$0]  %s20_s28, 1024, %s22_s8, [#allocation4], %s786_s29, %s786_s29, %s787_s30  }
   0xa   :  { %s789_s14 = smov [#allocation8]   ;;  %s790_s0 = smov [#allocation9]  }
   0xb   :  { %s47_s15 = sshll.u32 %s789_s14, 4  ;;  %s62_s16 = sshll.u32 %s790_s0, 4  ;;  %s48_s15 = int_to_ptr.vmem [resolvable:$true] %s47_s15  ;;  %s63_s16 = int_to_ptr.vmem [resolvable:$true] %s62_s16 }
   0xc   :  { %53 = dma.hbm_to_vmem [thread:$0]  %s46_s11, 4096, %s48_s15, [#allocation7], %s786_s29, %s786_s29, %s787_s30  }
   0xd   :  { %68 = dma.hbm_to_vmem [thread:$0]  %s61_s13, 2048, %s63_s16, [#allocation10], %s786_s29, %s786_s29, %s787_s30  }
   0xe   :  { %777 = dma.done.wait [#allocation4], 1024  }
   0xf   :  { %778 = vsyncadd [#allocation4], 4294966272 }
  0x10   :  { %779 = dma.done.wait [#allocation7], 6144  }
  0x11   :  { %780 = vsyncadd [#allocation7], 4294961152 }
  0x12   :  { %781 = dma.done.wait [#allocation10], 2048  }
  0x13   :  { %782 = vsyncadd [#allocation10], 4294965248  ;;  %v840_v0 = vld [vmem:[#allocation8 + $0x78] sm:$0xff]  ;;  %v842_v1 = vld [vmem:[#allocation8 + $0x70] sm:$0xff]  ;;  %v791_v16 = vmov 0.0   ;;  %s792_s18 = smov [#allocation11]  }
  0x14   :  { %104 = vmatpush.msra.mxu0 %v840_v0  ;;  %129 = vmatpush.msra.mxu1 %v840_v0  ;;  %v846_v2 = vld [vmem:[#allocation8 + $0x68] sm:$0xff]  ;;  %v852_v3 = vld [vmem:[#allocation8 + $0x60] sm:$0xff]  ;;  %v858_v4 = vld [vmem:[#allocation8 + $0x58] sm:$0xff]  ;;  %s633_s19 = sshll.u32 %s792_s18, 4  ;;  %s635_s22 = sshll.u32 %s1208_s6, 4  ;;  %s634_s19 = int_to_ptr.vmem [resolvable:$true] %s633_s19  ;;  %s636_s22 = int_to_ptr.hbm [resolvable:$true] %s635_s22 }
  0x15   :  { %155 = vmatpush.msra.mxu2 %v840_v0  ;;  %181 = vmatpush.msra.mxu3 %v840_v0  ;;  %v864_v5 = vld [vmem:[#allocation8 + $0x50] sm:$0xff]  ;;  %v870_v6 = vld [vmem:[#allocation8 + $0x48] sm:$0xff]  ;;  %v876_v7 = vld [vmem:[#allocation8 + $0x40] sm:$0xff] }
  0x16   :  { %105 = vmatpush.msra.mxu0 %v842_v1  ;;  %130 = vmatpush.msra.mxu1 %v842_v1  ;;  %v882_v8 = vld [vmem:[#allocation8 + $0x38] sm:$0xff]  ;;  %v888_v9 = vld [vmem:[#allocation8 + $0x30] sm:$0xff]  ;;  %v894_v10 = vld [vmem:[#allocation8 + $0x28] sm:$0xff] }
  0x17   :  { %156 = vmatpush.msra.mxu2 %v842_v1  ;;  %182 = vmatpush.msra.mxu3 %v842_v1  ;;  %v900_v11 = vld [vmem:[#allocation8 + $0x20] sm:$0xff]  ;;  %v906_v12 = vld [vmem:[#allocation8 + $0x18] sm:$0xff]  ;;  %v912_v13 = vld [vmem:[#allocation8 + $0x10] sm:$0xff] }
  0x18   :  { %106 = vmatpush.msra.mxu0 %v846_v2  ;;  %131 = vmatpush.msra.mxu1 %v846_v2  ;;  %v918_v14 = vld [vmem:[#allocation8 + $0x8] sm:$0xff]  ;;  %v924_v15 = vld [vmem:[#allocation8] sm:$0xff]  ;;  %v324_v25 = vld [vmem:[#allocation6 + $0x78] sm:$0xff] }
  0x19   :  { %157 = vmatpush.msra.mxu2 %v846_v2  ;;  %183 = vmatpush.msra.mxu3 %v846_v2  ;;  %v103_v17 = vld [vmem:[#allocation3] sm:$0xff]  ;;  %v128_v21 = vld [vmem:[#allocation3 + $0x8] sm:$0xff]  ;;  %v323_v26 = vld [vmem:[#allocation6 + $0x70] sm:$0xff] }
  0x1a   :  { %107 = vmatpush.msra.mxu0 %v852_v3  ;;  %132 = vmatpush.msra.mxu1 %v852_v3  ;;  %v322_v27 = vld [vmem:[#allocation6 + $0x68] sm:$0xff]  ;;  %v321_v28 = vld [vmem:[#allocation6 + $0x60] sm:$0xff]  ;;  %v320_v29 = vld [vmem:[#allocation6 + $0x58] sm:$0xff] }
  0x1b   :  { %158 = vmatpush.msra.mxu2 %v852_v3  ;;  %184 = vmatpush.msra.mxu3 %v852_v3  ;;  %v319_v30 = vld [vmem:[#allocation6 + $0x50] sm:$0xff]  ;;  %v318_v31 = vld [vmem:[#allocation6 + $0x48] sm:$0xff]  ;;  %v317_v32 = vld [vmem:[#allocation6 + $0x40] sm:$0xff] }
  0x1c   :  { %108 = vmatpush.msra.mxu0 %v858_v4  ;;  %133 = vmatpush.msra.mxu1 %v858_v4  ;;  %v316_v33 = vld [vmem:[#allocation6 + $0x38] sm:$0xff]  ;;  %v154_v34 = vld [vmem:[#allocation3 + $0x10] sm:$0xff]  ;;  %v314_v39 = vld [vmem:[#allocation6 + $0x28] sm:$0xff] }
  0x1d   :  { %159 = vmatpush.msra.mxu2 %v858_v4  ;;  %185 = vmatpush.msra.mxu3 %v858_v4  ;;  %v315_v38 = vld [vmem:[#allocation6 + $0x30] sm:$0xff]  ;;  %v313_v40 = vld [vmem:[#allocation6 + $0x20] sm:$0xff]  ;;  %v312_v41 = vld [vmem:[#allocation6 + $0x18] sm:$0xff] }
  0x1e   :  { %109 = vmatpush.msra.mxu0 %v864_v5  ;;  %134 = vmatpush.msra.mxu1 %v864_v5  ;;  %v311_v42 = vld [vmem:[#allocation6 + $0x10] sm:$0xff]  ;;  %v310_v43 = vld [vmem:[#allocation6 + $0x8] sm:$0xff]  ;;  %v309_v44 = vld [vmem:[#allocation6] sm:$0xff] }
  0x1f   :  { %160 = vmatpush.msra.mxu2 %v864_v5  ;;  %186 = vmatpush.msra.mxu3 %v864_v5  ;;  %v180_v45 = vld [vmem:[#allocation3 + $0x18] sm:$0xff]  ;;  %v1018_v50 = vld [vmem:[#allocation8 + $0xf0] sm:$0xff]  ;;  %v1022_v51 = vld [vmem:[#allocation8 + $0xe8] sm:$0xff] }
  0x20   :  { %110 = vmatpush.msra.mxu0 %v870_v6  ;;  %135 = vmatpush.msra.mxu1 %v870_v6  ;;  %v1016_v49 = vld [vmem:[#allocation8 + $0xf8] sm:$0xff]  ;;  %v1028_v52 = vld [vmem:[#allocation8 + $0xe0] sm:$0xff]  ;;  %v1042_v54 = vld [vmem:[#allocation8 + $0xd0] sm:$0xff] }
  0x21   :  { %161 = vmatpush.msra.mxu2 %v870_v6  ;;  %187 = vmatpush.msra.mxu3 %v870_v6  ;;  %v1034_v53 = vld [vmem:[#allocation8 + $0xd8] sm:$0xff]  ;;  %v1047_v55 = vld [vmem:[#allocation8 + $0xc8] sm:$0xff]  ;;  %v1053_v56 = vld [vmem:[#allocation8 + $0xc0] sm:$0xff] }
  0x22   :  { %111 = vmatpush.msra.mxu0 %v876_v7  ;;  %136 = vmatpush.msra.mxu1 %v876_v7  ;;  %v1059_v57 = vld [vmem:[#allocation8 + $0xb8] sm:$0xff]  ;;  %v1076_v58 = vld [vmem:[#allocation8 + $0xb0] sm:$0xff]  ;;  %v1080_v59 = vld [vmem:[#allocation8 + $0xa8] sm:$0xff] }
  0x23   :  { %162 = vmatpush.msra.mxu2 %v876_v7  ;;  %188 = vmatpush.msra.mxu3 %v876_v7  ;;  %v1086_v60 = vld [vmem:[#allocation8 + $0xa0] sm:$0xff]  ;;  %v1092_v61 = vld [vmem:[#allocation8 + $0x98] sm:$0xff]  ;;  %v1098_v62 = vld [vmem:[#allocation8 + $0x90] sm:$0xff] }
  0x24   :  { %112 = vmatpush.msra.mxu0 %v882_v8  ;;  %137 = vmatpush.msra.mxu1 %v882_v8  ;;  %v1104_v63 = vld [vmem:[#allocation8 + $0x88] sm:$0xff] }
  0x25   :  { %163 = vmatpush.msra.mxu2 %v882_v8  ;;  %189 = vmatpush.msra.mxu3 %v882_v8 }
  0x26   :  { %113 = vmatpush.msra.mxu0 %v888_v9  ;;  %138 = vmatpush.msra.mxu1 %v888_v9 }
  0x27   :  { %164 = vmatpush.msra.mxu2 %v888_v9  ;;  %190 = vmatpush.msra.mxu3 %v888_v9 }
  0x28   :  { %114 = vmatpush.msra.mxu0 %v894_v10  ;;  %139 = vmatpush.msra.mxu1 %v894_v10 }
  0x29   :  { %165 = vmatpush.msra.mxu2 %v894_v10  ;;  %191 = vmatpush.msra.mxu3 %v894_v10 }
  0x2a   :  { %115 = vmatpush.msra.mxu0 %v900_v11  ;;  %140 = vmatpush.msra.mxu1 %v900_v11 }
  0x2b   :  { %166 = vmatpush.msra.mxu2 %v900_v11  ;;  %192 = vmatpush.msra.mxu3 %v900_v11 }
  0x2c   :  { %116 = vmatpush.msra.mxu0 %v906_v12  ;;  %141 = vmatpush.msra.mxu1 %v906_v12 }
  0x2d   :  { %167 = vmatpush.msra.mxu2 %v906_v12  ;;  %193 = vmatpush.msra.mxu3 %v906_v12 }
  0x2e   :  { %117 = vmatpush.msra.mxu0 %v912_v13  ;;  %142 = vmatpush.msra.mxu1 %v912_v13 }
  0x2f   :  { %168 = vmatpush.msra.mxu2 %v912_v13  ;;  %194 = vmatpush.msra.mxu3 %v912_v13 }
  0x30   :  { %118 = vmatpush.msra.mxu0 %v918_v14  ;;  %143 = vmatpush.msra.mxu1 %v918_v14 }
  0x31   :  { %169 = vmatpush.msra.mxu2 %v918_v14  ;;  %195 = vmatpush.msra.mxu3 %v918_v14 }
  0x32   :  { %119 = vmatpush.msra.mxu0 %v924_v15  ;;  %144 = vmatpush.msra.mxu1 %v924_v15 }
  0x33   :  { %120 = vmatmul.f32.vlgmr.msra.gmra.mxu0 %v791_v16  ;;  %170 = vmatpush.msra.mxu2 %v924_v15 }
  0x34   :  { %196 = vmatpush.msra.mxu3 %v924_v15  ;;  %207 = vmatpush.msrb.mxu0 %v840_v0 }
  0x35   :  { %233 = vmatpush.msrb.mxu1 %v840_v0  ;;  %259 = vmatpush.msrb.mxu2 %v840_v0 }
  0x36   :  { %208 = vmatpush.msrb.mxu0 %v842_v1  ;;  %285 = vmatpush.msrb.mxu3 %v840_v0  ;;  %v1106_v0 = vld [vmem:[#allocation8 + $0x80] sm:$0xff] }
  0x37   :  { %234 = vmatpush.msrb.mxu1 %v842_v1  ;;  %260 = vmatpush.msrb.mxu2 %v842_v1 }
  0x38   :  { %209 = vmatpush.msrb.mxu0 %v846_v2  ;;  %286 = vmatpush.msrb.mxu3 %v842_v1  ;;  %v206_v1 = vld [vmem:[#allocation3 + $0x20] sm:$0xff] }
  0x39   :  { %235 = vmatpush.msrb.mxu1 %v846_v2  ;;  %261 = vmatpush.msrb.mxu2 %v846_v2 }
  0x3a   :  { %210 = vmatpush.msrb.mxu0 %v852_v3  ;;  %287 = vmatpush.msrb.mxu3 %v846_v2 }
  0x3b   :  { %236 = vmatpush.msrb.mxu1 %v852_v3  ;;  %262 = vmatpush.msrb.mxu2 %v852_v3 }
  0x3c   :  { %211 = vmatpush.msrb.mxu0 %v858_v4  ;;  %288 = vmatpush.msrb.mxu3 %v852_v3 }
  0x3d   :  { %237 = vmatpush.msrb.mxu1 %v858_v4  ;;  %263 = vmatpush.msrb.mxu2 %v858_v4 }
  0x3e   :  { %212 = vmatpush.msrb.mxu0 %v864_v5  ;;  %289 = vmatpush.msrb.mxu3 %v858_v4 }
  0x3f   :  { %238 = vmatpush.msrb.mxu1 %v864_v5  ;;  %264 = vmatpush.msrb.mxu2 %v864_v5 }
  0x40   :  { %213 = vmatpush.msrb.mxu0 %v870_v6  ;;  %290 = vmatpush.msrb.mxu3 %v864_v5  ;;  %v232_v5 = vld [vmem:[#allocation3 + $0x28] sm:$0xff] }
  0x41   :  { %239 = vmatpush.msrb.mxu1 %v870_v6  ;;  %265 = vmatpush.msrb.mxu2 %v870_v6 }
  0x42   :  { %214 = vmatpush.msrb.mxu0 %v876_v7  ;;  %291 = vmatpush.msrb.mxu3 %v870_v6 }
  0x43   :  { %240 = vmatpush.msrb.mxu1 %v876_v7  ;;  %266 = vmatpush.msrb.mxu2 %v876_v7 }
  0x44   :  { %215 = vmatpush.msrb.mxu0 %v882_v8  ;;  %292 = vmatpush.msrb.mxu3 %v876_v7 }
  0x45   :  { %241 = vmatpush.msrb.mxu1 %v882_v8  ;;  %267 = vmatpush.msrb.mxu2 %v882_v8 }
  0x46   :  { %216 = vmatpush.msrb.mxu0 %v888_v9  ;;  %293 = vmatpush.msrb.mxu3 %v882_v8  ;;  %v1154_v8 = vld [vmem:[%s1205_s3] ss:$0 sm:$0xff] }
  0x47   :  { %242 = vmatpush.msrb.mxu1 %v888_v9  ;;  %268 = vmatpush.msrb.mxu2 %v888_v9 }
  0x48   :  { %217 = vmatpush.msrb.mxu0 %v894_v10  ;;  %294 = vmatpush.msrb.mxu3 %v888_v9 }
  0x49   :  { %243 = vmatpush.msrb.mxu1 %v894_v10  ;;  %269 = vmatpush.msrb.mxu2 %v894_v10 }
  0x4a   :  { %218 = vmatpush.msrb.mxu0 %v900_v11  ;;  %295 = vmatpush.msrb.mxu3 %v894_v10 }
  0x4b   :  { %244 = vmatpush.msrb.mxu1 %v900_v11  ;;  %270 = vmatpush.msrb.mxu2 %v900_v11 }
  0x4c   :  { %219 = vmatpush.msrb.mxu0 %v906_v12  ;;  %296 = vmatpush.msrb.mxu3 %v900_v11 }
  0x4d   :  { %245 = vmatpush.msrb.mxu1 %v906_v12  ;;  %271 = vmatpush.msrb.mxu2 %v906_v12 }
  0x4e   :  { %220 = vmatpush.msrb.mxu0 %v912_v13  ;;  %297 = vmatpush.msrb.mxu3 %v906_v12 }
  0x4f   :  { %246 = vmatpush.msrb.mxu1 %v912_v13  ;;  %272 = vmatpush.msrb.mxu2 %v912_v13 }
  0x50   :  { %221 = vmatpush.msrb.mxu0 %v918_v14  ;;  %298 = vmatpush.msrb.mxu3 %v912_v13 }
  0x51   :  { %247 = vmatpush.msrb.mxu1 %v918_v14  ;;  %273 = vmatpush.msrb.mxu2 %v918_v14 }
  0x52   :  { %222 = vmatpush.msrb.mxu0 %v924_v15  ;;  %299 = vmatpush.msrb.mxu3 %v918_v14 }
  0x53   :  { %248 = vmatpush.msrb.mxu1 %v924_v15  ;;  %274 = vmatpush.msrb.mxu2 %v924_v15 }
  0x54   :  { %300 = vmatpush.msrb.mxu3 %v924_v15  ;;  %337 = vmatpush.msra.mxu0 %v324_v25  ;;  %v258_v15 = vld [vmem:[#allocation3 + $0x30] sm:$0xff] }
  0x56   :  { %338 = vmatpush.msra.mxu0 %v323_v26 }
  0x58   :  { %339 = vmatpush.msra.mxu0 %v322_v27 }
  0x5a   :  { %340 = vmatpush.msra.mxu0 %v321_v28 }
  0x5c   :  { %341 = vmatpush.msra.mxu0 %v320_v29 }
  0x5e   :  { %342 = vmatpush.msra.mxu0 %v319_v30 }
  0x60   :  { %343 = vmatpush.msra.mxu0 %v318_v31 }
  0x62   :  { %344 = vmatpush.msra.mxu0 %v317_v32 }
  0x64   :  { %345 = vmatpush.msra.mxu0 %v316_v33 }
  0x66   :  { %346 = vmatpush.msra.mxu0 %v315_v38 }
  0x68   :  { %347 = vmatpush.msra.mxu0 %v314_v39 }
  0x6a   :  { %348 = vmatpush.msra.mxu0 %v313_v40 }
  0x6c   :  { %349 = vmatpush.msra.mxu0 %v312_v41 }
  0x6e   :  { %350 = vmatpush.msra.mxu0 %v311_v42 }
  0x70   :  { %351 = vmatpush.msra.mxu0 %v310_v43 }
  0x72   :  { %352 = vmatpush.msra.mxu0 %v309_v44 }
  0xb0   :  { %v121_v18 = vpop.f32.mrf.mxu0 }
  0xb1   :  { %v1001_v19 = vadd.f32 %v121_v18, %v103_v17 }
  0xb3   :  { %v125_v20 = vmax.f32 %v1001_v19, 0.0 }
  0xb5   :  { %145 = vmatmul.f32.vlgmr.msra.gmra.mxu1 %v125_v20 }
  0xb6   :  { %404 = vmatpush.msra.mxu1 %v1016_v49 }
  0xb8   :  { %405 = vmatpush.msra.mxu1 %v1018_v50 }
  0xba   :  { %406 = vmatpush.msra.mxu1 %v1022_v51 }
  0xbc   :  { %407 = vmatpush.msra.mxu1 %v1028_v52 }
  0xbe   :  { %408 = vmatpush.msra.mxu1 %v1034_v53 }
  0xc0   :  { %409 = vmatpush.msra.mxu1 %v1042_v54 }
  0xc2   :  { %410 = vmatpush.msra.mxu1 %v1047_v55 }
  0xc4   :  { %411 = vmatpush.msra.mxu1 %v1053_v56 }
  0xc6   :  { %412 = vmatpush.msra.mxu1 %v1059_v57 }
  0xc8   :  { %413 = vmatpush.msra.mxu1 %v1076_v58 }
  0xca   :  { %414 = vmatpush.msra.mxu1 %v1080_v59 }
  0xcc   :  { %415 = vmatpush.msra.mxu1 %v1086_v60 }
  0xce   :  { %416 = vmatpush.msra.mxu1 %v1092_v61 }
  0xd0   :  { %417 = vmatpush.msra.mxu1 %v1098_v62 }
  0xd2   :  { %418 = vmatpush.msra.mxu1 %v1104_v63 }
  0xd4   :  { %419 = vmatpush.msra.mxu1 %v1106_v0 }
 0x132   :  { %v146_v22 = vpop.f32.mrf.mxu1 }
 0x133   :  { %v1006_v23 = vadd.f32 %v146_v22, %v128_v21 }
 0x135   :  { %v150_v24 = vmax.f32 %v1006_v23, 0.0 }
 0x137   :  { %171 = vmatmul.f32.vlgmr.msra.gmra.mxu2 %v150_v24 }
 0x138   :  { %427 = vmatpush.msra.mxu2 %v1016_v49 }
 0x13a   :  { %428 = vmatpush.msra.mxu2 %v1018_v50 }
 0x13c   :  { %429 = vmatpush.msra.mxu2 %v1022_v51 }
 0x13e   :  { %430 = vmatpush.msra.mxu2 %v1028_v52 }
 0x140   :  { %431 = vmatpush.msra.mxu2 %v1034_v53 }
 0x142   :  { %432 = vmatpush.msra.mxu2 %v1042_v54 }
 0x144   :  { %433 = vmatpush.msra.mxu2 %v1047_v55 }
 0x146   :  { %434 = vmatpush.msra.mxu2 %v1053_v56 }
 0x148   :  { %435 = vmatpush.msra.mxu2 %v1059_v57 }
 0x14a   :  { %436 = vmatpush.msra.mxu2 %v1076_v58 }
 0x14c   :  { %437 = vmatpush.msra.mxu2 %v1080_v59 }
 0x14e   :  { %438 = vmatpush.msra.mxu2 %v1086_v60 }
 0x150   :  { %439 = vmatpush.msra.mxu2 %v1092_v61 }
 0x152   :  { %440 = vmatpush.msra.mxu2 %v1098_v62 }
 0x154   :  { %441 = vmatpush.msra.mxu2 %v1104_v63 }
 0x156   :  { %442 = vmatpush.msra.mxu2 %v1106_v0 }
 0x1ba   :  { %v172_v35 = vpop.f32.mrf.mxu2 }
 0x1bb   :  { %v1011_v36 = vadd.f32 %v172_v35, %v154_v34 }
 0x1bd   :  { %v176_v37 = vmax.f32 %v1011_v36, 0.0 }
 0x1bf   :  { %197 = vmatmul.f32.vlgmr.msra.gmra.mxu3 %v176_v37 }
 0x1c0   :  { %450 = vmatpush.msra.mxu3 %v1016_v49 }
 0x1c2   :  { %451 = vmatpush.msra.mxu3 %v1018_v50 }
 0x1c4   :  { %452 = vmatpush.msra.mxu3 %v1022_v51 }
 0x1c6   :  { %453 = vmatpush.msra.mxu3 %v1028_v52 }
 0x1c8   :  { %454 = vmatpush.msra.mxu3 %v1034_v53 }
 0x1ca   :  { %455 = vmatpush.msra.mxu3 %v1042_v54 }
 0x1cc   :  { %456 = vmatpush.msra.mxu3 %v1047_v55 }
 0x1ce   :  { %457 = vmatpush.msra.mxu3 %v1053_v56 }
 0x1d0   :  { %458 = vmatpush.msra.mxu3 %v1059_v57 }
 0x1d2   :  { %459 = vmatpush.msra.mxu3 %v1076_v58 }
 0x1d4   :  { %460 = vmatpush.msra.mxu3 %v1080_v59 }
 0x1d6   :  { %461 = vmatpush.msra.mxu3 %v1086_v60 }
 0x1d8   :  { %462 = vmatpush.msra.mxu3 %v1092_v61 }
 0x1da   :  { %463 = vmatpush.msra.mxu3 %v1098_v62 }
 0x1dc   :  { %464 = vmatpush.msra.mxu3 %v1104_v63 }
 0x1de   :  { %465 = vmatpush.msra.mxu3 %v1106_v0 }
 0x242   :  { %v198_v46 = vpop.f32.mrf.mxu3 }
 0x243   :  { %v201_v47 = vadd.f32 %v198_v46, %v180_v45 }
 0x245   :  { %v202_v48 = vmax.f32 %v201_v47, 0.0 }
 0x247   :  { %223 = vmatmul.f32.vlgmr.msrb.gmra.mxu0 %v202_v48 }
 0x248   :  { %542 = vmatpush.msrb.mxu0 %v1016_v49 }
 0x24a   :  { %543 = vmatpush.msrb.mxu0 %v1018_v50 }
 0x24c   :  { %544 = vmatpush.msrb.mxu0 %v1022_v51 }
 0x24e   :  { %545 = vmatpush.msrb.mxu0 %v1028_v52 }
 0x24f   :  { %353 = vmatmul.f32.vlgmr.msra.gmra.mxu0 %v125_v20 }
 0x250   :  { %546 = vmatpush.msrb.mxu0 %v1034_v53 }
 0x252   :  { %547 = vmatpush.msrb.mxu0 %v1042_v54 }
 0x254   :  { %548 = vmatpush.msrb.mxu0 %v1047_v55 }
 0x256   :  { %549 = vmatpush.msrb.mxu0 %v1053_v56 }
 0x257   :  { %356 = vmatmul.f32.gmra.mxu0 %v150_v24  ;;  %v284_v24 = vld [vmem:[#allocation3 + $0x38] sm:$0xff] }
 0x258   :  { %550 = vmatpush.msrb.mxu0 %v1059_v57 }
 0x25a   :  { %551 = vmatpush.msrb.mxu0 %v1076_v58 }
 0x25c   :  { %552 = vmatpush.msrb.mxu0 %v1080_v59 }
 0x25e   :  { %553 = vmatpush.msrb.mxu0 %v1086_v60 }
 0x25f   :  { %359 = vmatmul.f32.gmra.mxu0 %v176_v37 }
 0x260   :  { %554 = vmatpush.msrb.mxu0 %v1092_v61 }
 0x262   :  { %555 = vmatpush.msrb.mxu0 %v1098_v62 }
 0x264   :  { %556 = vmatpush.msrb.mxu0 %v1104_v63 }
 0x266   :  { %557 = vmatpush.msrb.mxu0 %v1106_v0 }
 0x267   :  { %362 = vmatmul.f32.gmra.mxu0 %v202_v48  ;;  %v602_v48 = vld [vmem:[#allocation9 + $0x78] sm:$0xff] }
 0x2c4   :  { %v224_v2 = vpop.f32.mrf.mxu0 }
 0x2c5   :  { %v227_v3 = vadd.f32 %v224_v2, %v206_v1 }
 0x2c7   :  { %v228_v4 = vmax.f32 %v227_v3, 0.0  ;;  %v589_v3 = vld [vmem:[#allocation9 + $0x10] sm:$0xff] }
 0x2c9   :  { %249 = vmatmul.f32.vlgmr.msrb.gmra.mxu1 %v228_v4  ;;  %365 = vmatmul.f32.gmra.mxu0 %v228_v4  ;;  %v588_v4 = vld [vmem:[#allocation9 + $0x8] sm:$0xff] }
 0x2ca   :  { %473 = vmatpush.msrb.mxu1 %v1016_v49 }
 0x2cc   :  { %474 = vmatpush.msrb.mxu1 %v1018_v50  ;;  %v354_v10 = vpop.f32.mrf.mxu0 }
 0x2cd   :  { %v355_v11 = vadd.f32 %v1154_v8, %v354_v10 }
 0x2ce   :  { %475 = vmatpush.msrb.mxu1 %v1022_v51 }
 0x2d0   :  { %476 = vmatpush.msrb.mxu1 %v1028_v52 }
 0x2d1   :  { %420 = vmatmul.f32.vlgmr.msra.gmra.mxu1 %v791_v16 }
 0x2d2   :  { %477 = vmatpush.msrb.mxu1 %v1034_v53 }
 0x2d4   :  { %478 = vmatpush.msrb.mxu1 %v1042_v54  ;;  %v357_v19 = vpop.f32.mrf.mxu0 }
 0x2d5   :  { %v358_v20 = vadd.f32 %v1154_v8, %v357_v19 }
 0x2d6   :  { %479 = vmatpush.msrb.mxu1 %v1047_v55 }
 0x2d8   :  { %480 = vmatpush.msrb.mxu1 %v1053_v56 }
 0x2da   :  { %481 = vmatpush.msrb.mxu1 %v1059_v57 }
 0x2dc   :  { %482 = vmatpush.msrb.mxu1 %v1076_v58  ;;  %v360_v28 = vpop.f32.mrf.mxu0 }
 0x2dd   :  { %v361_v29 = vadd.f32 %v1154_v8, %v360_v28 }
 0x2de   :  { %483 = vmatpush.msrb.mxu1 %v1080_v59 }
 0x2e0   :  { %484 = vmatpush.msrb.mxu1 %v1086_v60 }
 0x2e2   :  { %485 = vmatpush.msrb.mxu1 %v1092_v61 }
 0x2e4   :  { %486 = vmatpush.msrb.mxu1 %v1098_v62  ;;  %v363_v33 = vpop.f32.mrf.mxu0 }
 0x2e5   :  { %v364_v34 = vadd.f32 %v1154_v8, %v363_v33 }
 0x2e6   :  { %487 = vmatpush.msrb.mxu1 %v1104_v63 }
 0x2e8   :  { %488 = vmatpush.msrb.mxu1 %v1106_v0 }
 0x2ea   :  { %565 = vmatpush.msra.mxu1 %v1016_v49 }
 0x2ec   :  { %566 = vmatpush.msra.mxu1 %v1018_v50 }
 0x2ee   :  { %567 = vmatpush.msra.mxu1 %v1022_v51 }
 0x2f0   :  { %568 = vmatpush.msra.mxu1 %v1028_v52 }
 0x2f2   :  { %569 = vmatpush.msra.mxu1 %v1034_v53 }
 0x2f4   :  { %570 = vmatpush.msra.mxu1 %v1042_v54 }
 0x2f6   :  { %571 = vmatpush.msra.mxu1 %v1047_v55 }
 0x2f8   :  { %572 = vmatpush.msra.mxu1 %v1053_v56 }
 0x2fa   :  { %573 = vmatpush.msra.mxu1 %v1059_v57 }
 0x2fc   :  { %574 = vmatpush.msra.mxu1 %v1076_v58 }
 0x2fe   :  { %575 = vmatpush.msra.mxu1 %v1080_v59 }
 0x300   :  { %576 = vmatpush.msra.mxu1 %v1086_v60 }
 0x302   :  { %577 = vmatpush.msra.mxu1 %v1092_v61 }
 0x304   :  { %578 = vmatpush.msra.mxu1 %v1098_v62 }
 0x306   :  { %579 = vmatpush.msra.mxu1 %v1104_v63 }
 0x308   :  { %580 = vmatpush.msra.mxu1 %v1106_v0 }
 0x346   :  { %v250_v6 = vpop.f32.mrf.mxu1  ;;  %v366_v38 = vpop.f32.mrf.mxu0 }
 0x347   :  { %v253_v7 = vadd.f32 %v250_v6, %v232_v5  ;;  %v367_v39 = vadd.f32 %v1154_v8, %v366_v38  ;;  %v587_v5 = vld [vmem:[#allocation9] sm:$0xff] }
 0x349   :  { %v254_v9 = vmax.f32 %v253_v7, 0.0 }
 0x34b   :  { %275 = vmatmul.f32.vlgmr.msrb.gmra.mxu2 %v254_v9  ;;  %368 = vmatmul.f32.gmra.mxu0 %v254_v9 }
 0x34c   :  { %496 = vmatpush.msrb.mxu2 %v1016_v49 }
 0x34e   :  { %v421_v12 = vpop.f32.mrf.mxu1  ;;  %497 = vmatpush.msrb.mxu2 %v1018_v50 }
 0x34f   :  { %v424_v13 = vadd.f32 %v421_v12, %v355_v11  ;;  %v656_v11 = vld [vmem:[%s1207_s5] ss:$0 sm:$0xff] }
 0x350   :  { %498 = vmatpush.msrb.mxu2 %v1022_v51 }
 0x351   :  { %v425_v14 = vmax.f32 %v424_v13, 0.0 }
 0x352   :  { %499 = vmatpush.msrb.mxu2 %v1028_v52 }
 0x353   :  { %443 = vmatmul.f32.vlgmr.msra.gmra.mxu2 %v425_v14 }
 0x354   :  { %500 = vmatpush.msrb.mxu2 %v1034_v53 }
 0x356   :  { %501 = vmatpush.msrb.mxu2 %v1042_v54 }
 0x358   :  { %502 = vmatpush.msrb.mxu2 %v1047_v55 }
 0x35a   :  { %503 = vmatpush.msrb.mxu2 %v1053_v56 }
 0x35c   :  { %504 = vmatpush.msrb.mxu2 %v1059_v57 }
 0x35e   :  { %505 = vmatpush.msrb.mxu2 %v1076_v58 }
 0x360   :  { %506 = vmatpush.msrb.mxu2 %v1080_v59 }
 0x362   :  { %507 = vmatpush.msrb.mxu2 %v1086_v60 }
 0x364   :  { %508 = vmatpush.msrb.mxu2 %v1092_v61 }
 0x366   :  { %509 = vmatpush.msrb.mxu2 %v1098_v62 }
 0x368   :  { %510 = vmatpush.msrb.mxu2 %v1104_v63 }
 0x36a   :  { %511 = vmatpush.msrb.mxu2 %v1106_v0 }
 0x36c   :  { %607 = vmatpush.msra.mxu2 %v602_v48 }
 0x3c8   :  { %v369_v43 = vpop.f32.mrf.mxu0 }
 0x3c9   :  { %v370_v44 = vadd.f32 %v1154_v8, %v369_v43 }
 0x3ce   :  { %v276_v16 = vpop.f32.mrf.mxu2 }
 0x3cf   :  { %v279_v17 = vadd.f32 %v276_v16, %v258_v15 }
 0x3d1   :  { %v280_v18 = vmax.f32 %v279_v17, 0.0 }
 0x3d3   :  { %301 = vmatmul.f32.vlgmr.msrb.gmra.mxu3 %v280_v18  ;;  %371 = vmatmul.f32.gmra.mxu0 %v280_v18 }
 0x3d4   :  { %519 = vmatpush.msrb.mxu3 %v1016_v49  ;;  %v601_v49 = vld [vmem:[#allocation9 + $0x70] sm:$0xff] }
 0x3d5   :  { %608 = vmatpush.msra.mxu2 %v601_v49 }
 0x3d6   :  { %v444_v21 = vpop.f32.mrf.mxu2  ;;  %520 = vmatpush.msrb.mxu3 %v1018_v50  ;;  %v600_v50 = vld [vmem:[#allocation9 + $0x68] sm:$0xff] }
 0x3d7   :  { %v447_v22 = vadd.f32 %v444_v21, %v358_v20  ;;  %609 = vmatpush.msra.mxu2 %v600_v50 }
 0x3d8   :  { %521 = vmatpush.msrb.mxu3 %v1022_v51  ;;  %v599_v51 = vld [vmem:[#allocation9 + $0x60] sm:$0xff] }
 0x3d9   :  { %v448_v23 = vmax.f32 %v447_v22, 0.0  ;;  %610 = vmatpush.msra.mxu2 %v599_v51 }
 0x3da   :  { %522 = vmatpush.msrb.mxu3 %v1028_v52  ;;  %v598_v52 = vld [vmem:[#allocation9 + $0x58] sm:$0xff] }
 0x3db   :  { %466 = vmatmul.f32.vlgmr.msra.gmra.mxu3 %v448_v23  ;;  %611 = vmatpush.msra.mxu2 %v598_v52 }
 0x3dc   :  { %523 = vmatpush.msrb.mxu3 %v1034_v53  ;;  %v597_v53 = vld [vmem:[#allocation9 + $0x50] sm:$0xff] }
 0x3dd   :  { %612 = vmatpush.msra.mxu2 %v597_v53 }
 0x3de   :  { %524 = vmatpush.msrb.mxu3 %v1042_v54  ;;  %v596_v54 = vld [vmem:[#allocation9 + $0x48] sm:$0xff] }
 0x3df   :  { %613 = vmatpush.msra.mxu2 %v596_v54 }
 0x3e0   :  { %525 = vmatpush.msrb.mxu3 %v1047_v55 }
 0x3e2   :  { %526 = vmatpush.msrb.mxu3 %v1053_v56  ;;  %v595_v56 = vld [vmem:[#allocation9 + $0x40] sm:$0xff] }
 0x3e3   :  { %614 = vmatpush.msra.mxu2 %v595_v56 }
 0x3e4   :  { %527 = vmatpush.msrb.mxu3 %v1059_v57  ;;  %v594_v57 = vld [vmem:[#allocation9 + $0x38] sm:$0xff] }
 0x3e5   :  { %615 = vmatpush.msra.mxu2 %v594_v57 }
 0x3e6   :  { %528 = vmatpush.msrb.mxu3 %v1076_v58  ;;  %v593_v58 = vld [vmem:[#allocation9 + $0x30] sm:$0xff] }
 0x3e7   :  { %616 = vmatpush.msra.mxu2 %v593_v58 }
 0x3e8   :  { %529 = vmatpush.msrb.mxu3 %v1080_v59  ;;  %v592_v59 = vld [vmem:[#allocation9 + $0x28] sm:$0xff] }
 0x3e9   :  { %617 = vmatpush.msra.mxu2 %v592_v59 }
 0x3ea   :  { %530 = vmatpush.msrb.mxu3 %v1086_v60 }
 0x3ec   :  { %531 = vmatpush.msrb.mxu3 %v1092_v61  ;;  %v591_v61 = vld [vmem:[#allocation9 + $0x20] sm:$0xff] }
 0x3ed   :  { %618 = vmatpush.msra.mxu2 %v591_v61 }
 0x3ee   :  { %532 = vmatpush.msrb.mxu3 %v1098_v62  ;;  %v590_v62 = vld [vmem:[#allocation9 + $0x18] sm:$0xff] }
 0x3ef   :  { %619 = vmatpush.msra.mxu2 %v590_v62 }
 0x3f0   :  { %533 = vmatpush.msrb.mxu3 %v1104_v63 }
 0x3f1   :  { %620 = vmatpush.msra.mxu2 %v589_v3 }
 0x3f2   :  { %534 = vmatpush.msrb.mxu3 %v1106_v0 }
 0x3f3   :  { %621 = vmatpush.msra.mxu2 %v588_v4 }
 0x3f5   :  { %622 = vmatpush.msra.mxu2 %v587_v5 }
 0x450   :  { %v372_v55 = vpop.f32.mrf.mxu0 }
 0x451   :  { %v373_v63 = vadd.f32 %v1154_v8, %v372_v55 }
 0x456   :  { %v302_v25 = vpop.f32.mrf.mxu3 }
 0x457   :  { %v305_v26 = vadd.f32 %v302_v25, %v284_v24 }
 0x459   :  { %v306_v27 = vmax.f32 %v305_v26, 0.0 }
 0x45b   :  { %374 = vmatmul.f32.gmra.mxu0 %v306_v27 }
 0x45e   :  { %v467_v30 = vpop.f32.mrf.mxu3 }
 0x45f   :  { %v470_v31 = vadd.f32 %v467_v30, %v361_v29 }
 0x461   :  { %v471_v32 = vmax.f32 %v470_v31, 0.0 }
 0x463   :  { %489 = vmatmul.f32.vlgmr.msrb.gmra.mxu1 %v471_v32 }
 0x4d8   :  { %v375_v60 = vpop.f32.mrf.mxu0 }
 0x4d9   :  { %v376_v6 = vadd.f32 %v1154_v8, %v375_v60 }
 0x4e0   :  { %v490_v35 = vpop.f32.mrf.mxu1 }
 0x4e1   :  { %v493_v36 = vadd.f32 %v490_v35, %v364_v34 }
 0x4e3   :  { %v494_v37 = vmax.f32 %v493_v36, 0.0 }
 0x4e5   :  { %512 = vmatmul.f32.vlgmr.msrb.gmra.mxu2 %v494_v37 }
 0x568   :  { %v513_v40 = vpop.f32.mrf.mxu2 }
 0x569   :  { %v516_v41 = vadd.f32 %v513_v40, %v367_v39 }
 0x56b   :  { %v517_v42 = vmax.f32 %v516_v41, 0.0 }
 0x56d   :  { %535 = vmatmul.f32.vlgmr.msrb.gmra.mxu3 %v517_v42 }
 0x5f0   :  { %v536_v45 = vpop.f32.mrf.mxu3 }
 0x5f1   :  { %v539_v46 = vadd.f32 %v536_v45, %v370_v44 }
 0x5f3   :  { %v540_v47 = vmax.f32 %v539_v46, 0.0 }
 0x5f5   :  { %558 = vmatmul.f32.vlgmr.msrb.gmra.mxu0 %v540_v47 }
 0x672   :  { %v559_v0 = vpop.f32.mrf.mxu0 }
 0x673   :  { %v562_v1 = vadd.f32 %v559_v0, %v373_v63 }
 0x675   :  { %v563_v2 = vmax.f32 %v562_v1, 0.0 }
 0x677   :  { %581 = vmatmul.f32.vlgmr.msra.gmra.mxu1 %v563_v2 }
 0x6f4   :  { %v582_v7 = vpop.f32.mrf.mxu1 }
 0x6f5   :  { %v585_v9 = vadd.f32 %v582_v7, %v376_v6 }
 0x6f7   :  { %v586_v10 = vmax.f32 %v585_v9, 0.0 }
 0x6f9   :  { %623 = vmatmul.f32.vlgmr.msra.gmra.mxu2 %v586_v10 }
 0x77c   :  { %v624_v12 = vpop.f32.mrf.mxu2 }
 0x77d   :  { %v625_v13 = vadd.f32 %v656_v11, %v624_v12 }
 0x77f   :  { %627 = vst [vmem:[#allocation11] sm:$0xff] %v625_v13 }
 0x780   :  { %638 = dma.vmem_to_hbm [thread:$0]  %s634_s19, 128, %s636_s22, [#allocation5]  }
 0x781   :  { %783 = dma.done.wait [#allocation5], 128  }
 0x782   :  { %784 = vsyncadd [#allocation5], 4294967168 }
 0x783   :  { %643 = vsyncpa [#allocation4], 1 }
 0x784   :  { %644 = vsyncpa [#allocation7], 1 }
 0x785   :  { %645 = vsyncpa [#allocation10], 1 }
 0x786   :  { %646 = vsyncpa [#allocation5], 1 }

</bundles_post_ra>
